<compile_context>
chip_gen: v7x
topology: tpu7x:2x2x1
jax: 0.10.0
libtpu: 0.0.40
codegen_flags: <defaults>
</compile_context>

<pallas_src>
import functools
import math

import jax
import jax.numpy as jnp
from jax.experimental import pallas as pl
from jax.experimental.pallas import tpu as pltpu

_MIB = 1024 * 1024


def _round_up(x: int, m: int) -> int:
    return ((x + m - 1) // m) * m


@functools.lru_cache(maxsize=None)
def _vmem_capacity_bytes() -> int:
    try:
        return int(pltpu.get_tpu_info().vmem_capacity_bytes)
    except Exception:
        return 64 * _MIB  # conservative default (v7x per-TensorCore VMEM)


@functools.lru_cache(maxsize=None)
def _single_buffer_supported() -> bool:
    """Probe whether BlockSpec(pipeline_mode=pl.Buffered(1)) compiles & runs.

    Constant-index (revisited) weight blocks do not need double buffering;
    single-buffering halves their VMEM footprint.  Probed with a tiny kernel
    so unsupported jax versions gracefully fall back to plain specs.
    """
    if not hasattr(pl, "Buffered"):
        return False
    try:
        def k(c_ref, x_ref, o_ref):
            o_ref[...] = x_ref[...] + c_ref[...]

        f = pl.pallas_call(
            k,
            out_shape=jax.ShapeDtypeStruct((16, 128), jnp.float32),
            grid=(2,),
            in_specs=[
                pl.BlockSpec((8, 128), lambda i: (0, 0),
                             pipeline_mode=pl.Buffered(1)),
                pl.BlockSpec((8, 128), lambda i: (i, 0)),
            ],
            out_specs=pl.BlockSpec((8, 128), lambda i: (i, 0)),
        )
        out = f(jnp.zeros((8, 128), jnp.float32),
                jnp.ones((16, 128), jnp.float32))
        jax.block_until_ready(out)
        return True
    except Exception:
        return False


# --------------------------------------------------------------------------
# Fused whole-MLP kernel (weights VMEM-resident, batch tiled on a parallel
# grid axis).
# --------------------------------------------------------------------------
def _fused_mlp_kernel(*refs, relu_flags):
    """refs = (x_ref, w0, b0, w1, b1, ..., o_ref)."""
    x_ref = refs[0]
    o_ref = refs[-1]
    wb = refs[1:-1]

    h = x_ref[...].astype(jnp.float32)
    for l, relu in enumerate(relu_flags):
        w = wb[2 * l][...]
        b = wb[2 * l + 1][...]
        lhs = h if w.dtype == jnp.float32 else h.astype(w.dtype)
        h = jnp.dot(lhs, w, preferred_element_type=jnp.float32)
        h = h + b.astype(jnp.float32)  # (1, Dout) broadcasts over batch rows
        if relu:
            h = jnp.maximum(h, 0.0)
    o_ref[...] = h.astype(o_ref.dtype)


# --------------------------------------------------------------------------
# Per-layer (M,N,K)-tiled fallback kernel (used only when the resident
# weights would not fit the VMEM budget, e.g. very wide layers on v7x).
# --------------------------------------------------------------------------
def _linear_kernel(x_ref, w_ref, b_ref, o_ref, acc_ref, *, relu):
    @pl.when(pl.program_id(2) == 0)
    def _():
        acc_ref[...] = jnp.zeros_like(acc_ref)

    lhs = x_ref[...]
    w = w_ref[...]
    if lhs.dtype != w.dtype:
        lhs = lhs.astype(w.dtype)
    acc_ref[...] += jnp.dot(lhs, w, preferred_element_type=jnp.float32)

    @pl.when(pl.program_id(2) == pl.num_programs(2) - 1)
    def _():
        r = acc_ref[...] + b_ref[...].astype(jnp.float32)
        if relu:
            r = jnp.maximum(r, 0.0)
        o_ref[...] = r.astype(o_ref.dtype)


def _divisor_tile(dim: int, prefer: int, step: int) -> int:
    t = min(prefer, dim)
    t -= t % step
    t = max(t, step)
    while dim % t:
        t -= step
    return t


def _tiled_linear(x, w_p, b_p, relu, out_dtype):
    Bp, din_p = x.shape
    dout_p = w_p.shape[1]
    tm = _divisor_tile(Bp, 256, 8)
    tk = _divisor_tile(din_p, 512, 128)
    tn = _divisor_tile(dout_p, 512, 128)
    grid = (Bp // tm, dout_p // tn, din_p // tk)

    itemsize = jnp.dtype(x.dtype).itemsize
    vmem_need = (2 * (tm * tk + tk * tn + tn) * itemsize
                 + 2 * tm * tn * jnp.dtype(out_dtype).itemsize
                 + tm * tn * 4)
    vmem_limit = int(min(_vmem_capacity_bytes() * 0.9,
                         max(2 * vmem_need, 32 * _MIB)))

    return pl.pallas_call(
        functools.partial(_linear_kernel, relu=relu),
        out_shape=jax.ShapeDtypeStruct((Bp, dout_p), out_dtype),
        grid=grid,
        in_specs=[
            pl.BlockSpec((tm, tk), lambda i, j, k: (i, k)),
            pl.BlockSpec((tk, tn), lambda i, j, k: (k, j)),
            pl.BlockSpec((1, tn), lambda i, j, k: (0, j)),
        ],
        out_specs=pl.BlockSpec((tm, tn), lambda i, j, k: (i, j)),
        scratch_shapes=[pltpu.VMEM((tm, tn), jnp.float32)],
        compiler_params=pltpu.CompilerParams(
            dimension_semantics=("parallel", "parallel", "arbitrary"),
            vmem_limit_bytes=vmem_limit,
        ),
        cost_estimate=pl.CostEstimate(
            flops=2 * Bp * din_p * dout_p,
            transcendentals=0,
            bytes_accessed=int((Bp * din_p + din_p * dout_p + dout_p
                                + Bp * dout_p) * itemsize),
        ),
    )(x, w_p, b_p)


def _mlp_layer_by_layer(x, padded_params, relu_flags, true_out_dim, dtype):
    B, Din = x.shape
    din_p = padded_params[0][0].shape[0]
    Bp = _round_up(B, 8)
    if (Bp, din_p) != (B, Din):
        h = jnp.zeros((Bp, din_p), dtype).at[:B, :Din].set(x)
    else:
        h = x
    for (w_p, b_p), relu in zip(padded_params, relu_flags):
        h = _tiled_linear(h, w_p, b_p, relu, dtype)
    out_dim_p = padded_params[-1][0].shape[1]
    if Bp == B and out_dim_p == true_out_dim:
        return h
    return h[:B, :true_out_dim]


# --------------------------------------------------------------------------
# Forward pass (shape-static Python; runs under jit).
# --------------------------------------------------------------------------
def fcnn_forward(x, padded_params, *, relu_flags, true_out_dim,
                 single_buffer, vmem_capacity):
    B, Din = x.shape
    dtype = x.dtype
    itemsize = jnp.dtype(dtype).itemsize

    dims_p = [padded_params[0][0].shape[0]] + [w.shape[1] for (w, _) in padded_params]
    din_p, out_dim_p = dims_p[0], dims_p[-1]
    max_dim_p = max(dims_p)

    weight_bytes = int(sum(w.size * w.dtype.itemsize + b.size * b.dtype.itemsize
                           for (w, b) in padded_params))
    resident_bytes = weight_bytes if single_buffer else 2 * weight_bytes

    # Generation heuristics derived from per-core VMEM capacity:
    # v7x: 64 MiB, 2 TensorCores; v5e/v6e: 128 MiB, 1 TensorCore.
    two_core_hint = vmem_capacity < 100 * _MIB
    tile_cap = 256 if two_core_hint else 512
    budget = int(vmem_capacity * 0.8)

    # Per-batch-row VMEM working set: f32 activation + next-layer product,
    # plus double-buffered input/output tiles.
    per_row = 2 * max_dim_p * 4 + 2 * (din_p + out_dim_p) * itemsize

    if resident_bytes + 8 * per_row > budget:
        # Weights do not fit in VMEM: per-layer K/N-tiled path (activations
        # round-trip HBM between layers).
        return _mlp_layer_by_layer(x, padded_params, relu_flags,
                                   true_out_dim, dtype)

    # ---- batch-tile selection ------------------------------------------
    bt = (budget - resident_bytes) // per_row
    bt = max(8, (bt // 8) * 8)
    bt = min(bt, tile_cap, _round_up(B, 8))
    if two_core_hint and B >= 16:
        # keep >=2 (and an even number of) grid steps so both v7x cores work
        bt = min(bt, _round_up(-(-B // 2), 8))
        n_steps = -(-B // bt)
        if n_steps > 2 and n_steps % 2:
            bt_even = _round_up(-(-B // (n_steps + 1)), 8)
            if bt_even >= 8:
                bt = bt_even

    needs_pad = (Din != din_p) or (B % 8 != 0)
    if needs_pad:
        Bp = _round_up(B, bt)
        x_in = jnp.zeros((Bp, din_p), dtype).at[:B, :Din].set(x)
    else:
        Bp = B          # feed x directly: no HBM round-trip for padding
        x_in = x
    grid = (-(-Bp // bt),)

    need_vmem = resident_bytes + bt * per_row
    vmem_limit = int(min(vmem_capacity * 0.92,
                         max(need_vmem * 1.25, 32 * _MIB)))

    const_kw = {"pipeline_mode": pl.Buffered(1)} if single_buffer else {}
    in_specs = [pl.BlockSpec((bt, din_p), lambda i: (i, 0))]
    inputs = [x_in]
    flops = 0
    for (w_p, b_p) in padded_params:
        d_in, d_out = w_p.shape
        # Same block every grid step -> stays VMEM-resident (no re-DMA).
        in_specs.append(pl.BlockSpec((d_in, d_out), lambda i: (0, 0), **const_kw))
        in_specs.append(pl.BlockSpec((1, d_out), lambda i: (0, 0), **const_kw))
        inputs += [w_p, b_p]
        flops += 2 * Bp * d_in * d_out

    bytes_accessed = int(weight_bytes + (Bp * din_p + Bp * out_dim_p) * itemsize)

    out_p = pl.pallas_call(
        functools.partial(_fused_mlp_kernel, relu_flags=relu_flags),
        out_shape=jax.ShapeDtypeStruct((Bp, out_dim_p), dtype),
        grid=grid,
        in_specs=in_specs,
        out_specs=pl.BlockSpec((bt, out_dim_p), lambda i: (i, 0)),
        compiler_params=pltpu.CompilerParams(
            dimension_semantics=("parallel",),
            vmem_limit_bytes=vmem_limit,
        ),
        cost_estimate=pl.CostEstimate(flops=flops, transcendentals=0,
                                      bytes_accessed=bytes_accessed),
    )(*inputs)

    if Bp == B and out_dim_p == true_out_dim:
        return out_p        # no extra slice copy on the hot path
    # TODO(synk): for large B with tiny true output dims, fold this slice into
    # the consumer to avoid an extra (Bp x out_dim_p) HBM copy.
    return out_p[:B, :true_out_dim]


# --------------------------------------------------------------------------
# Module wrapper (mirrors the PyTorch FCNN forward pass).
# --------------------------------------------------------------------------
class FCNNPallas:
    """JAX/Pallas port of the PyTorch FCNN module (forward pass only).

    dtype=jnp.bfloat16 is recommended on v6e/v7x (2x+ MXU rate, half the
    VMEM/HBM footprint; accumulation stays f32), at the cost of a looser
    tolerance vs an f32 reference.  Default is f32 for the strict check below.
    """

    def __init__(self, input_dim, output_dim, hiddens_config,
                 disconnect_relu_layer_ids=(), key=None, dtype=jnp.float32):
        self.input_dim = input_dim
        self.output_dim = output_dim
        self.hiddens_config = list(hiddens_config)
        self.disconnect_relu_layer_ids = set(disconnect_relu_layer_ids)
        self.dtype = dtype

        if key is None:
            key = jax.random.PRNGKey(0)

        dims = [input_dim] + self.hiddens_config + [output_dim]
        self._true_dims = dims

        # nn.Linear-style init: U(-1/sqrt(fan_in), +1/sqrt(fan_in)); weights
        # stored (in, out).  Padding to 128-lane multiples is done ONCE here
        # and only the padded copies are kept (no per-call padding, no
        # duplicate HBM copies).
        padded, relu_flags = [], []
        n_layers = len(dims) - 1
        for counter, (din, dout) in enumerate(zip(dims[:-1], dims[1:])):
            key, kw, kb = jax.random.split(key, 3)
            bound = 1.0 / math.sqrt(din)
            w = jax.random.uniform(kw, (din, dout), jnp.float32, -bound, bound)
            b = jax.random.uniform(kb, (dout,), jnp.float32, -bound, bound)
            din_p, dout_p = _round_up(din, 128), _round_up(dout, 128)
            w_p = jnp.zeros((din_p, dout_p), dtype).at[:din, :dout].set(w.astype(dtype))
            b_p = jnp.zeros((1, dout_p), dtype).at[0, :dout].set(b.astype(dtype))
            padded.append((w_p, b_p))
            is_last = counter == n_layers - 1
            relu_flags.append((not is_last)
                              and (counter not in self.disconnect_relu_layer_ids))
        self.padded_params = tuple(padded)
        self._relu_flags = tuple(relu_flags)

        self._single_buffer = _single_buffer_supported()
        self._vmem_capacity = _vmem_capacity_bytes()

        self._forward = jax.jit(functools.partial(
            fcnn_forward,
            relu_flags=self._relu_flags,
            true_out_dim=output_dim,
            single_buffer=self._single_buffer,
            vmem_capacity=self._vmem_capacity,
        ))

    def __call__(self, x):
        return self._forward(x.astype(self.dtype), self.padded_params)

    def reference(self, x):
        """Pure-JAX reference for correctness checking."""
        dims = self._true_dims
        h = x
        for (w_p, b_p), relu, din, dout in zip(self.padded_params,
                                               self._relu_flags,
                                               dims[:-1], dims[1:]):
            h = h @ w_p[:din, :dout] + b_p[0, :dout]
            if relu:
                h = jnp.maximum(h, 0.0)
        return h


if __name__ == "__main__":
    # ---- test 1: small, unaligned dims (zero-padding path, ReLU of layer 1
    # disconnected, single batch tile) ------------------------------------
    model = FCNNPallas(32, 16, [64, 64], disconnect_relu_layer_ids=[1],
                       key=jax.random.PRNGKey(0))
    x = jax.random.normal(jax.random.PRNGKey(42), (8, 32), jnp.float32)
    out = jax.block_until_ready(model(x))
    ref = model.reference(x)
    assert out.shape == (8, 16), out.shape
    assert jnp.allclose(out, ref, atol=1e-5, rtol=1e-5), \
        float(jnp.max(jnp.abs(out - ref)))

    # ---- test 2: lane/sublane-aligned dims (direct feed, no padding copies,
    # multi-step parallel batch grid, VMEM-resident weights) ---------------
    model2 = FCNNPallas(128, 128, [256], key=jax.random.PRNGKey(1))
    x2 = jax.random.normal(jax.random.PRNGKey(7), (1024, 128), jnp.float32)
    out2 = jax.block_until_ready(model2(x2))
    ref2 = model2.reference(x2)
    assert out2.shape == (1024, 128), out2.shape
    assert jnp.allclose(out2, ref2, atol=5e-4, rtol=5e-4), \
        float(jnp.max(jnp.abs(out2 - ref2)))

    print("KERNEL_OK")
</pallas_src>

<mosaic_0001>
module attributes {stable_mosaic.version = 11 : i64} {
  func.func @k(%arg0: i32, %arg1: memref<8x128xf32, #tpu.memory_space<vmem>>, %arg2: memref<8x128xf32, #tpu.memory_space<vmem>>, %arg3: memref<8x128xf32, #tpu.memory_space<vmem>>) attributes {dimension_semantics = [#tpu.dimension_semantics<arbitrary>], iteration_bounds = array<i64: 2>, scalar_prefetch = 0 : i64, scratch_operands = 0 : i64, tpu.core_type = #tpu.core_type<tc>, window_params = [{pipeline_mode = #tpu.pipeline_mode<synchronous>, transform_indices = @transform_0, window_bounds = array<i64: 8, 128>}, {transform_indices = @transform_1, window_bounds = array<i64: 8, 128>}, {transform_indices = @transform_2, window_bounds = array<i64: 8, 128>}]} {
    %c0 = arith.constant 0 : index
    %c0_0 = arith.constant 0 : index
    %0 = vector.load %arg2[%c0, %c0_0] : memref<8x128xf32, #tpu.memory_space<vmem>>, vector<8x128xf32>
    %c0_1 = arith.constant 0 : index
    %c0_2 = arith.constant 0 : index
    %1 = vector.load %arg1[%c0_1, %c0_2] : memref<8x128xf32, #tpu.memory_space<vmem>>, vector<8x128xf32>
    %2 = arith.addf %0, %1 : vector<8x128xf32>
    %c0_3 = arith.constant 0 : index
    %c0_4 = arith.constant 0 : index
    %3 = vector.load %arg3[%c0_3, %c0_4] : memref<8x128xf32, #tpu.memory_space<vmem>>, vector<8x128xf32>
    tpu.vector_store %arg3[%c0_3, %c0_4], %2 {strides = array<i32>} : memref<8x128xf32, #tpu.memory_space<vmem>>, vector<8x128xf32>,
    return
  }
  func.func @transform_0(%arg0: i32) -> (i32, i32) {
    %c0_i32 = arith.constant 0 : i32
    %c0_i32_0 = arith.constant 0 : i32
    %c0_i32_1 = arith.constant 0 : i32
    return %c0_i32, %c0_i32_0 : i32, i32
  }
  func.func @transform_1(%arg0: i32) -> (i32, i32) {
    %c0_i32 = arith.constant 0 : i32
    %c0_i32_0 = arith.constant 0 : i32
    return %arg0, %c0_i32 : i32, i32
  }
  func.func @transform_2(%arg0: i32) -> (i32, i32) {
    %c0_i32 = arith.constant 0 : i32
    %c0_i32_0 = arith.constant 0 : i32
    return %arg0, %c0_i32 : i32, i32
  }
}

module attributes {stable_mosaic.version = 11 : i64} {
  func.func @_fused_mlp_kernel(%arg0: i32, %arg1: memref<8x128xf32, #tpu.memory_space<vmem>>, %arg2: memref<128x128xf32, #tpu.memory_space<vmem>>, %arg3: memref<1x128xf32, #tpu.memory_space<vmem>>, %arg4: memref<128x128xf32, #tpu.memory_space<vmem>>, %arg5: memref<1x128xf32, #tpu.memory_space<vmem>>, %arg6: memref<128x128xf32, #tpu.memory_space<vmem>>, %arg7: memref<1x128xf32, #tpu.memory_space<vmem>>, %arg8: memref<8x128xf32, #tpu.memory_space<vmem>>) attributes {dimension_semantics = [#tpu.dimension_semantics<parallel>], iteration_bounds = array<i64: 1>, scalar_prefetch = 0 : i64, scratch_operands = 0 : i64, tpu.core_type = #tpu.core_type<tc>, window_params = [{transform_indices = @transform_0, window_bounds = array<i64: 8, 128>}, {pipeline_mode = #tpu.pipeline_mode<synchronous>, transform_indices = @transform_1, window_bounds = array<i64: 128, 128>}, {pipeline_mode = #tpu.pipeline_mode<synchronous>, transform_indices = @transform_2, window_bounds = array<i64: 1, 128>}, {pipeline_mode = #tpu.pipeline_mode<synchronous>, transform_indices = @transform_3, window_bounds = array<i64: 128, 128>}, {pipeline_mode = #tpu.pipeline_mode<synchronous>, transform_indices = @transform_4, window_bounds = array<i64: 1, 128>}, {pipeline_mode = #tpu.pipeline_mode<synchronous>, transform_indices = @transform_5, window_bounds = array<i64: 128, 128>}, {pipeline_mode = #tpu.pipeline_mode<synchronous>, transform_indices = @transform_6, window_bounds = array<i64: 1, 128>}, {transform_indices = @transform_7, window_bounds = array<i64: 8, 128>}]} {
    %c0 = arith.constant 0 : index
    %c0_0 = arith.constant 0 : index
    %0 = vector.load %arg1[%c0, %c0_0] : memref<8x128xf32, #tpu.memory_space<vmem>>, vector<8x128xf32>
    %c0_1 = arith.constant 0 : index
    %c0_2 = arith.constant 0 : index
    %1 = vector.load %arg2[%c0_1, %c0_2] : memref<128x128xf32, #tpu.memory_space<vmem>>, vector<128x128xf32>
    %c0_3 = arith.constant 0 : index
    %c0_4 = arith.constant 0 : index
    %2 = vector.load %arg3[%c0_3, %c0_4] : memref<1x128xf32, #tpu.memory_space<vmem>>, vector<1x128xf32>
    %cst = arith.constant dense<0.000000e+00> : vector<8x128xf32>
    %3 = tpu.matmul %0, %1, %cst {dimension_numbers = #tpu.dot_dimension_numbers<[1], [0], [0], [1], [0, 0, 1, 1], [], []>} : vector<8x128xf32>, vector<128x128xf32>, vector<8x128xf32> -> vector<8x128xf32>
    %4 = vector.broadcast %2 : vector<1x128xf32> to vector<8x128xf32>
    %5 = arith.addf %3, %4 : vector<8x128xf32>
    %cst_5 = arith.constant 0.000000e+00 : f32
    %6 = vector.broadcast %cst_5 : f32 to vector<8x128xf32>
    %7 = arith.maximumf %5, %6 : vector<8x128xf32>
    %c0_6 = arith.constant 0 : index
    %c0_7 = arith.constant 0 : index
    %8 = vector.load %arg4[%c0_6, %c0_7] : memref<128x128xf32, #tpu.memory_space<vmem>>, vector<128x128xf32>
    %c0_8 = arith.constant 0 : index
    %c0_9 = arith.constant 0 : index
    %9 = vector.load %arg5[%c0_8, %c0_9] : memref<1x128xf32, #tpu.memory_space<vmem>>, vector<1x128xf32>
    %cst_10 = arith.constant dense<0.000000e+00> : vector<8x128xf32>
    %10 = tpu.matmul %7, %8, %cst_10 {dimension_numbers = #tpu.dot_dimension_numbers<[1], [0], [0], [1], [0, 0, 1, 1], [], []>} : vector<8x128xf32>, vector<128x128xf32>, vector<8x128xf32> -> vector<8x128xf32>
    %11 = vector.broadcast %9 : vector<1x128xf32> to vector<8x128xf32>
    %12 = arith.addf %10, %11 : vector<8x128xf32>
    %c0_11 = arith.constant 0 : index
    %c0_12 = arith.constant 0 : index
    %13 = vector.load %arg6[%c0_11, %c0_12] : memref<128x128xf32, #tpu.memory_space<vmem>>, vector<128x128xf32>
    %c0_13 = arith.constant 0 : index
    %c0_14 = arith.constant 0 : index
    %14 = vector.load %arg7[%c0_13, %c0_14] : memref<1x128xf32, #tpu.memory_space<vmem>>, vector<1x128xf32>
    %cst_15 = arith.constant dense<0.000000e+00> : vector<8x128xf32>
    %15 = tpu.matmul %12, %13, %cst_15 {dimension_numbers = #tpu.dot_dimension_numbers<[1], [0], [0], [1], [0, 0, 1, 1], [], []>} : vector<8x128xf32>, vector<128x128xf32>, vector<8x128xf32> -> vector<8x128xf32>
    %16 = vector.broadcast %14 : vector<1x128xf32> to vector<8x128xf32>
    %17 = arith.addf %15, %16 : vector<8x128xf32>
    %c0_16 = arith.constant 0 : index
    %c0_17 = arith.constant 0 : index
    %18 = vector.load %arg8[%c0_16, %c0_17] : memref<8x128xf32, #tpu.memory_space<vmem>>, vector<8x128xf32>
    tpu.vector_store %arg8[%c0_16, %c0_17], %17 {strides = array<i32>} : memref<8x128xf32, #tpu.memory_space<vmem>>, vector<8x128xf32>,
    return
  }
  func.func @transform_0(%arg0: i32) -> (i32, i32) {
    %c0_i32 = arith.constant 0 : i32
    %c0_i32_0 = arith.constant 0 : i32
    return %arg0, %c0_i32 : i32, i32
  }
  func.func @transform_1(%arg0: i32) -> (i32, i32) {
    %c0_i32 = arith.constant 0 : i32
    %c0_i32_0 = arith.constant 0 : i32
    %c0_i32_1 = arith.constant 0 : i32
    return %c0_i32, %c0_i32_0 : i32, i32
  }
  func.func @transform_2(%arg0: i32) -> (i32, i32) {
    %c0_i32 = arith.constant 0 : i32
    %c0_i32_0 = arith.constant 0 : i32
    %c0_i32_1 = arith.constant 0 : i32
    return %c0_i32, %c0_i32_0 : i32, i32
  }
  func.func @transform_3(%arg0: i32) -> (i32, i32) {
    %c0_i32 = arith.constant 0 : i32
    %c0_i32_0 = arith.constant 0 : i32
    %c0_i32_1 = arith.constant 0 : i32
    return %c0_i32, %c0_i32_0 : i32, i32
  }
  func.func @transform_4(%arg0: i32) -> (i32, i32) {
    %c0_i32 = arith.constant 0 : i32
    %c0_i32_0 = arith.constant 0 : i32
    %c0_i32_1 = arith.constant 0 : i32
    return %c0_i32, %c0_i32_0 : i32, i32
  }
  func.func @transform_5(%arg0: i32) -> (i32, i32) {
    %c0_i32 = arith.constant 0 : i32
    %c0_i32_0 = arith.constant 0 : i32
    %c0_i32_1 = arith.constant 0 : i32
    return %c0_i32, %c0_i32_0 : i32, i32
  }
  func.func @transform_6(%arg0: i32) -> (i32, i32) {
    %c0_i32 = arith.constant 0 : i32
    %c0_i32_0 = arith.constant 0 : i32
    %c0_i32_1 = arith.constant 0 : i32
    return %c0_i32, %c0_i32_0 : i32, i32
  }
  func.func @transform_7(%arg0: i32) -> (i32, i32) {
    %c0_i32 = arith.constant 0 : i32
    %c0_i32_0 = arith.constant 0 : i32
    return %arg0, %c0_i32 : i32, i32
  }
}

</mosaic_0001>

<bundles_post_ra>
// kernel: tpu_custom_call.1
= control target key start
LH: loop header
LB: loop body
LE: loop exit
PB: predicated region body
PF: predicated region fallthrough
CT: control target
= control target key end

     0   :  { %7 = vsyncpa [#allocation3], 0  ;;  %s692_s0 = inlined_call_operand.hbm [shape: f32[8,128], index: 0, kind: input, shape index: {}]   ;;  %s693_s1 = inlined_call_operand.hbm [shape: f32[16,128], index: 1, kind: input, shape index: {}]   ;;  %s694_s2 = inlined_call_operand.hbm [shape: f32[16,128], index: 2, kind: output, shape index: {}]  }
   0x1   :  { %8 = vsyncpa [#allocation6], 0 }
   0x2   :  { %10 = vsyncpa [#allocation6 + $0x1], 0 }
   0x3   :  { %11 = vsyncpa [#allocation4], 0 }
   0x4   :  { %13 = vsyncpa [#allocation4 + $0x1], 0  ;;  %s491_s9 = smov 0   ;;  %s493_s10 = smov 0  }
   0x5   :  { %s495_s11 = smov 0   ;;  %s497_s12 = smov 0  }
   0x6 LB: > { %s512_s13 = sadd.s32 4294967295, %s471_s12   ;;  %s272_s14 = sadd.s32 4294967294, %s471_s12   ;;  %s471_s12 = sphi %s497_s12, %s718_s12   ;;  %s467_s11 = sphi %s495_s11, %s717_s11   ;;  %s463_s10 = sphi %s493_s10, %s716_s10   ;;  %s459_s9 = sphi %s491_s9, %s715_s9  }
   0x7   : > { %p60_p0 = scmp.ne.s32.totalorder %s463_s10, %s459_s9  ;;  %p695_p1 = scmp.eq.s32.totalorder %s512_s13, 0 }
   0x8   : > { %p90_p3 = scmp.eq.s32.totalorder %s272_s14, 1  ;;  %p273_p5 = scmp.ge.s32.totalorder %s471_s12, 1 }
   0x9   : > { %p521_p4 = por %p695_p1, %p60_p0  ;;  %p97_p7 = scmp.lt.s32.totalorder %s471_s12, 3 }
   0xa   : > { %p526_p6 = por %p90_p3, %p60_p0  ;;  %s473_s18 = smov [#allocation2]  }
   0xb   : > { %s698_s15 = scalar_select %p521_p4, 1, 0 }
   0xc   : > { %s699_s16 = scalar_select %p526_p6, 1, 0 }
   0xd   : > { %p531_p8 = pnand %p273_p5, %p97_p7  ;;  %s110_s19 = sshll.u32 %s473_s18, 4  ;;  %s111_s19 = int_to_ptr.vmem [resolvable:$true] %s110_s19 }
   0xe   : > { %s539_s20 = sadd.s32 1, %s471_s12   ;;  %s47_s24 = sadd.s32 1, %s467_s11 }
   0xf   : > { %s700_s17 = scalar_select %p531_p8, 1, 0 }
  0x10   : > { %p294_p10 = pneg %p531_p8  ;;  %s44_s22 = ssub.s32 %s471_s12, %s539_s20 }
  0x11   : > { %p549_p12 = scmp.eq.s32.totalorder %s44_s22, 0  ;;  %s343_s27 = scalar_lea.hbm %s692_s0, 128 }
  0x12   : > { %p543_p11 = pnand %p294_p10, %p695_p1  ;;  %p344_p0 = scmp.ne.s32.totalorder %s692_s0, %s343_s27 }
  0x13   : > { %s702_s23 = scalar_select %p549_p12, 1, 0 }
  0x14   : > { %p345_p3 = pneg %p543_p11  ;;  %p350_p10 = scmp.lt.u32.totalorder %s343_s27, %s692_s0 }
  0x16   : > { %p346_p5 = pnand %p345_p3, %p344_p0 }
  0x18   : > { %p347_p7 = pneg %p346_p5 }
  0x1a   : > { %p352_p9 = pnand %p350_p10, %p347_p7 }
  0x1c   : > { %355 = shalt.err (!%p352_p9)
}
  0x1d   : > { %s356_s4 = scalar_lea.vmem %s111_s19, 128  ;;  %p364_p6 = scmp.lt.s32.totalorder %s111_s19, %s111_s19 }
  0x1e   : > { %p357_p1 = scmp.ne.s32.totalorder %s111_s19, %s356_s4  ;;  %p365_p4 = scmp.lt.s32.totalorder %s356_s4, %s356_s4 }
  0x20   : > { %p359_p2 = pnand %p357_p1, %p345_p3  ;;  %p366_p8 = por %p365_p4, %p364_p6 }
  0x22   : > { %p360_p13 = pneg %p359_p2 }
  0x24   : > { %p367_p12 = pnand %p366_p8, %p360_p13 }
  0x26   : > { %370 = shalt.err (!%p367_p12)
}
  0x27   : > { %297 = dma.hbm_to_vmem [thread:$0]  (!%p543_p11), %s692_s0, 128, %s111_s19, [#allocation3]  }
  0x28   : > { %p703_p1 = scmp.ne.s32.totalorder %s702_s23, 0  ;;  %p55_p2 = scmp.eq.s32.totalorder %s471_s12, 0 }
  0x29   : > { %p704_p4 = scmp.ne.s32.totalorder %s467_s11, %s463_s10  ;;  %p705_p6 = scmp.eq.s32.totalorder %s512_s13, 1 }
  0x2a   : > { %s575_s7 = scalar_select %p703_p1, %s467_s11, %s47_s24  }
  0x2b   : > { %p583_p8 = por %p705_p6, %p704_p4  ;;  %p307_p9 = scmp.lt.s32.totalorder %s471_s12, 2 }
  0x2c   : > { %s121_s14 = sand.u32 1, %s467_s11   ;;  %p707_p12 = pmov %p704_p4 }
  0x2d   : > { %s276_s18 = sshll.u32 %s121_s14, 3  ;;  %s277_s21 = sshll.u32 %s471_s12, 7 }
  0x2e   : > { %p56_p13 = por %p55_p2, %p707_p12  ;;  %s596_s19 = scalar_lea.hbm %s693_s1, %s277_s21 }
  0x2f   : > { %s125_s23 = scalar_lea.vmem [#allocation5], %s276_s18  ;;  %s122_s27 = scalar_lea.sflag [#allocation6], %s121_s14 }
  0x30   : > { %s132_s24 = sshll.u32 %s125_s23, 4  ;;  %p598_p11 = pnand %p307_p9, %p56_p13  ;;  %s602_s24 = int_to_ptr.vmem [resolvable:$true] %s132_s24 }
  0x31   : > { %s371_s28 = scalar_lea.hbm %s596_s19, 128  ;;  %s376_s3 = scalar_lea.hbm %s693_s1, 256 }
  0x32   : > { %p372_p0 = scmp.ne.s32.totalorder %s596_s19, %s371_s28  ;;  %p373_p3 = pneg %p598_p11 }
  0x33   : > { %p377_p10 = scmp.lt.u32.totalorder %s596_s19, %s693_s1  ;;  %p378_p1 = scmp.lt.u32.totalorder %s376_s3, %s371_s28 }
  0x34   : > { %p374_p5 = pnand %p373_p3, %p372_p0  ;;  %p380_p4 = scmp.lt.u32.totalorder %s371_s28, %s596_s19 }
  0x35   : > { %p379_p2 = por %p378_p1, %p377_p10 }
  0x36   : > { %p375_p7 = pneg %p374_p5 }
  0x37   : > { %p381_p6 = por %p380_p4, %p379_p2 }
  0x39   : > { %p382_p9 = pnand %p381_p6, %p375_p7 }
  0x3b   : > { %385 = shalt.err (!%p382_p9)
}
  0x3c   : > { %s386_s6 = scalar_lea.vmem %s602_s24, 128  ;;  %s474_s14 = smov [#allocation5]  }
  0x3d   : > { %p387_p12 = scmp.ne.s32.totalorder %s602_s24, %s386_s6  ;;  %s391_s18 = sshll.u32 %s474_s14, 4  ;;  %s392_s18 = int_to_ptr.vmem [resolvable:$false] %s391_s18 }
  0x3e   : > { %s393_s21 = scalar_lea.vmem %s392_s18, 256  ;;  %p394_p5 = scmp.lt.s32.totalorder %s602_s24, %s392_s18 }
  0x3f   : > { %p389_p13 = pnand %p387_p12, %p373_p3  ;;  %p395_p10 = scmp.lt.s32.totalorder %s393_s21, %s386_s6 }
  0x41   : > { %p390_p0 = pneg %p389_p13  ;;  %p396_p1 = por %p395_p10, %p394_p5 }
  0x43   : > { %p397_p2 = pnand %p396_p1, %p390_p0 }
  0x45   : > { %400 = shalt.err (!%p397_p2)
}
  0x46   : > { %301 = dma.hbm_to_vmem [thread:$0]  (!%p598_p11), %s596_s19, 128, %s602_s24, %s122_s27  }
  0x47   : > { %p709_p7 = scmp.ne.s32.totalorder %s700_s17, 0 }
  0x48   : > { %p710_p3 = scmp.eq.s32.totalorder (!%p709_p7), %s512_s13, 0 }
  0x49   : > { %141 = sbr.rel (%p709_p7) target bundleno = 110 (0x6e), region = 28 }
  0x50   : > { %446 = dma.done.wait (%p710_p3), [#allocation3], 128   ;;  %p711_p4 = pmov %p710_p3 }
  0x51   : > { %s636_s22 = sand.u32 1, %s463_s10   ;;  %p712_p6 = scmp.ne.s32.totalorder %s698_s15, 0 }
  0x52   : > { %448 = vsyncadd (%p711_p4), [#allocation3], 4294967168  ;;  %s280_s25 = sshll.u32 %s636_s22, 3  ;;  %s148_s23 = scalar_lea.sflag [#allocation6], %s636_s22 }
  0x53   : > { %s151_s26 = scalar_lea.vmem [#allocation5], %s280_s25 }
  0x54   : > { %450 = dma.done.wait (%p712_p6), %s148_s23, 128  }
  0x55   : > { %452 = vsyncadd (%p712_p6), %s148_s23, 4294967168  ;;  %s171_s17 = scalar_lea.vmem [#allocation7], %s280_s25  ;;  %s283_s24 = sshll.u32 %s512_s13, 7  ;;  %v172_v0 = vld [vmem:[%s151_s26] sm:$0xff]  ;;  %v173_v1 = vld [vmem:[#allocation2] sm:$0xff] }
  0x56   : > { %s190_s19 = sshll.u32 %s171_s17, 4  ;;  %v174_v2 = vadd.f32 %v173_v1, %v172_v0  ;;  %s650_s29 = scalar_lea.hbm %s694_s2, %s283_s24  ;;  %s645_s19 = int_to_ptr.vmem [resolvable:$true] %s190_s19 }
  0x57   : > { %s177_s15 = scalar_lea.sflag [#allocation4], %s636_s22  ;;  %s401_s30 = scalar_lea.vmem %s645_s19, 128 }
  0x58   : > { %175 = vst [vmem:[%s171_s17] sm:$0xff] %v174_v2  ;;  %p402_p11 = scmp.ne.s32.totalorder %s645_s19, %s401_s30  ;;  %s475_s13 = smov [#allocation7]  }
  0x59   : > { %s405_s3 = sshll.u32 %s475_s13, 4  ;;  %s406_s3 = int_to_ptr.vmem [resolvable:$false] %s405_s3 }
  0x5a   : > { %p403_p9 = pnand %p402_p11, %p583_p8  ;;  %s407_s4 = scalar_lea.vmem %s406_s3, 256 }
  0x5b   : > { %p408_p13 = scmp.lt.s32.totalorder %s645_s19, %s406_s3  ;;  %p409_p0 = scmp.lt.s32.totalorder %s407_s4, %s401_s30 }
  0x5c   : > { %p404_p12 = pneg %p403_p9 }
  0x5d   : > { %p410_p5 = por %p409_p0, %p408_p13 }
  0x5f   : > { %p411_p10 = pnand %p410_p5, %p404_p12 }
  0x61   : > { %414 = shalt.err (!%p411_p10)
}
  0x62   : > { %s415_s5 = scalar_lea.hbm %s650_s29, 128  ;;  %s419_s18 = scalar_lea.hbm %s694_s2, 256 }
  0x63   : > { %p416_p1 = scmp.ne.s32.totalorder %s650_s29, %s415_s5  ;;  %p420_p3 = scmp.lt.u32.totalorder %s650_s29, %s694_s2 }
  0x64   : > { %p421_p4 = scmp.lt.u32.totalorder %s419_s18, %s415_s5  ;;  %p423_p11 = scmp.lt.u32.totalorder %s415_s5, %s650_s29 }
  0x65   : > { %p417_p2 = pnand %p416_p1, %p583_p8 }
  0x66   : > { %p422_p6 = por %p421_p4, %p420_p3 }
  0x67   : > { %p418_p7 = pneg %p417_p2 }
  0x68   : > { %p424_p9 = por %p423_p11, %p422_p6 }
  0x6a   : > { %p425_p12 = pnand %p424_p9, %p418_p7 }
  0x6c   : > { %428 = shalt.err (!%p425_p12)
}
  0x6d   : > { %292 = dma.vmem_to_hbm [thread:$0]  (%p583_p8), %s645_s19, 128, %s650_s29, %s177_s15  }
  0x6e PF: > { %s202_s25 = sand.u32 1, %s459_s9   ;;  %p713_p13 = scmp.ne.s32.totalorder %s699_s16, 0 }
  0x6f   : > { %p714_p0 = scmp.ge.s32.totalorder %s471_s12, 2  ;;  %s203_s23 = scalar_lea.sflag [#allocation4], %s202_s25 }
  0x71   : > { %p303_p5 = pnand %p714_p0, %p713_p13 }
  0x73   : > { %454 = dma.done.wait (!%p303_p5), %s203_s23, 128  }
  0x74   : > { %456 = vsyncadd (!%p303_p5), %s203_s23, 4294967168  ;;  %p16_p10 = scmp.ge.s32.totalorder %s539_s20, 4   ;;  %s715_s9 = smov %s463_s10 }
  0x75   : > { %s716_s10 = smov %s467_s11  ;;  %s717_s11 = smov %s575_s7 }
  0x76   : > { %s718_s12 = smov %s539_s20  ;;  %18 = sbr.rel (!%p16_p10) target bundleno = 6 (0x6), region = 78 }
  0x7d   :  { %208 = vsyncpa [#allocation3], 1 }
  0x7e   :  { %210 = vsyncpa [#allocation3 + $0x1], 1 }
  0x7f   :  { %211 = vsyncpa [#allocation6], 1 }
  0x80   :  { %213 = vsyncpa [#allocation6 + $0x1], 1 }
  0x81   :  { %214 = vsyncpa [#allocation4], 1 }
  0x82   :  { %216 = vsyncpa [#allocation4 + $0x1], 1 }

// kernel: fcnn_forward.1
= control target key start
LH: loop header
LB: loop body
LE: loop exit
PB: predicated region body
PF: predicated region fallthrough
CT: control target
= control target key end

     0   :  { %12 = vsyncpa [#allocation3], 0  ;;  %s855_s0 = inlined_call_operand.vmem [shape: f32[8,128], index: 0, kind: input, shape index: {}]   ;;  %s856_s1 = inlined_call_operand.hbm [shape: f32[128,128], index: 1, kind: input, shape index: {}]   ;;  %s857_s2 = inlined_call_operand.vmem [shape: f32[1,128], index: 2, kind: input, shape index: {}]   ;;  %s858_s3 = inlined_call_operand.hbm [shape: f32[128,128], index: 3, kind: input, shape index: {}]   ;;  %s859_s4 = inlined_call_operand.vmem [shape: f32[1,128], index: 4, kind: input, shape index: {}]   ;;  %s860_s5 = inlined_call_operand.hbm [shape: f32[128,128], index: 5, kind: input, shape index: {}]   ;;  %s861_s6 = inlined_call_operand.vmem [shape: f32[1,128], index: 6, kind: input, shape index: {}]   ;;  %s862_s7 = inlined_call_operand.hbm [shape: f32[8,128], index: 7, kind: output, shape index: {}]  }
   0x1   :  { %13 = vsyncpa [#allocation6], 0 }
   0x2   :  { %14 = vsyncpa [#allocation4], 0  ;;  %s700_s24 = smov [#allocation5]   ;;  %s701_s26 = smov [#allocation2]  }
   0x3   :  { %s36_s25 = sshll.u32 %s700_s24, 4  ;;  %s22_s27 = sshll.u32 %s701_s26, 4  ;;  %s37_s25 = int_to_ptr.vmem [resolvable:$true] %s36_s25  ;;  %s749_s27 = int_to_ptr.vmem [resolvable:$true] %s22_s27 }
   0x4   :  { %s606_s30 = scalar_lea.hbm %s858_s3, 2048 }
   0x5   :  { %p607_p0 = scmp.ne.s32.totalorder %s858_s3, %s606_s30  ;;  %p610_p1 = scmp.lt.u32.totalorder %s606_s30, %s858_s3 }
   0x7   :  { %p612_p2 = pnand %p610_p1, %p607_p0 }
   0x9   :  { %615 = shalt.err (!%p612_p2)
}
   0xa   :  { %s616_s12 = scalar_lea.vmem %s37_s25, 2048  ;;  %p621_p4 = scmp.lt.s32.totalorder %s37_s25, %s37_s25 }
   0xb   :  { %p617_p3 = scmp.ne.s32.totalorder %s37_s25, %s616_s12  ;;  %p622_p5 = scmp.lt.s32.totalorder %s616_s12, %s616_s12 }
   0xd   :  { %p623_p6 = por %p622_p5, %p621_p4 }
   0xf   :  { %p624_p7 = pnand %p623_p6, %p617_p3 }
  0x11   :  { %627 = shalt.err (!%p624_p7)
}
  0x12   :  { %s702_s13 = smov 128   ;;  %s703_s14 = smov 8  }
  0x13   :  { %42 = dma.hbm_to_vmem [thread:$0]  %s858_s3, 2048, %s37_s25, [#allocation6], %s702_s13, %s702_s13, %s703_s14  }
  0x14   :  { %s628_s19 = scalar_lea.hbm %s856_s1, 2048 }
  0x15   :  { %p629_p8 = scmp.ne.s32.totalorder %s856_s1, %s628_s19  ;;  %p632_p9 = scmp.lt.u32.totalorder %s628_s19, %s856_s1 }
  0x17   :  { %p634_p10 = pnand %p632_p9, %p629_p8 }
  0x19   :  { %637 = shalt.err (!%p634_p10)
}
  0x1a   :  { %s638_s24 = scalar_lea.vmem %s749_s27, 2048  ;;  %p643_p12 = scmp.lt.s32.totalorder %s749_s27, %s749_s27 }
  0x1b   :  { %p639_p11 = scmp.ne.s32.totalorder %s749_s27, %s638_s24  ;;  %p644_p13 = scmp.lt.s32.totalorder %s638_s24, %s638_s24 }
  0x1d   :  { %p645_p0 = por %p644_p13, %p643_p12 }
  0x1f   :  { %p646_p1 = pnand %p645_p0, %p639_p11 }
  0x21   :  { %649 = shalt.err (!%p646_p1)
}
  0x22   :  { %28 = dma.hbm_to_vmem [thread:$0]  %s856_s1, 2048, %s749_s27, [#allocation3], %s702_s13, %s702_s13, %s703_s14  }
  0x23   :  { %s704_s26 = smov [#allocation7]   ;;  %s650_s8 = scalar_lea.hbm %s860_s5, 2048 }
  0x24   :  { %s50_s28 = sshll.u32 %s704_s26, 4  ;;  %p651_p2 = scmp.ne.s32.totalorder %s860_s5, %s650_s8  ;;  %s51_s28 = int_to_ptr.vmem [resolvable:$true] %s50_s28 }
  0x25   :  { %p654_p3 = scmp.lt.u32.totalorder %s650_s8, %s860_s5 }
  0x27   :  { %p656_p4 = pnand %p654_p3, %p651_p2 }
  0x29   :  { %659 = shalt.err (!%p656_p4)
}
  0x2a   :  { %s660_s15 = scalar_lea.vmem %s51_s28, 2048  ;;  %p665_p6 = scmp.lt.s32.totalorder %s51_s28, %s51_s28 }
  0x2b   :  { %p661_p5 = scmp.ne.s32.totalorder %s51_s28, %s660_s15  ;;  %p666_p7 = scmp.lt.s32.totalorder %s660_s15, %s660_s15 }
  0x2d   :  { %p667_p8 = por %p666_p7, %p665_p6 }
  0x2f   :  { %p668_p9 = pnand %p667_p8, %p661_p5 }
  0x31   :  { %671 = shalt.err (!%p668_p9)
}
  0x32   :  { %56 = dma.hbm_to_vmem [thread:$0]  %s860_s5, 2048, %s51_s28, [#allocation6], %s702_s13, %s702_s13, %s703_s14  }
  0x33   :  { %694 = dma.done.wait [#allocation3], 2048  }
  0x34   :  { %695 = vsyncadd [#allocation3], 4294965248 }
  0x35   :  { %696 = dma.done.wait [#allocation6], 4096  }
  0x36   :  { %697 = vsyncadd [#allocation6], 4294963200  ;;  %v705_v0 = vmov 0.0|0.0   ;;  %vm706_vm0 = vmmov 0   ;;  %v707_v1 = vmov 0.0   ;;  %v69_v2 = vld [vmem:[#allocation2] sm:$0xff] }
  0x37   :  { %525 = vmatprep.subr.bf16.mxu0 %v705_v0  ;;  %452 = vmatprep.mubr.msk.f32.mxu0 %vm706_vm0, %v707_v1  ;;  %v70_v3 = vld [vmem:[#allocation2 + $0x8] sm:$0xff]  ;;  %v71_v4 = vld [vmem:[#allocation2 + $0x10] sm:$0xff]  ;;  %v72_v6 = vld [vmem:[#allocation2 + $0x18] sm:$0xff] }
  0x38   :  { %549 = vmatprep.subr.bf16.mxu1 %v705_v0  ;;  %487 = vmatprep.mubr.msk.f32.mxu1 %vm706_vm0, %v707_v1  ;;  %v526_v5 = vpack.c.bf16 %v70_v3, %v69_v2  ;;  %v529_v7 = vpack.c.bf16 %v72_v6, %v71_v4  ;;  %v73_v8 = vld [vmem:[#allocation2 + $0x20] sm:$0xff]  ;;  %v74_v9 = vld [vmem:[#allocation2 + $0x28] sm:$0xff]  ;;  %v165_v12 = vld [vmem:[#allocation5 + $0x10] sm:$0xff] }
  0x39   :  { %v163_v10 = vld [vmem:[#allocation5] sm:$0xff]  ;;  %v164_v11 = vld [vmem:[#allocation5 + $0x8] sm:$0xff]  ;;  %v166_v13 = vld [vmem:[#allocation5 + $0x18] sm:$0xff]  ;;  %v532_v14 = vpack.c.bf16 %v74_v9, %v73_v8 }
  0x3a   :  { %527 = vmatpush3.bf16.msra.mxu0 %v526_v5  ;;  %v550_v15 = vpack.c.bf16 %v164_v11, %v163_v10  ;;  %v75_v16 = vld [vmem:[#allocation2 + $0x30] sm:$0xff]  ;;  %v76_v17 = vld [vmem:[#allocation2 + $0x38] sm:$0xff]  ;;  %v553_v18 = vpack.c.bf16 %v166_v13, %v165_v12  ;;  %v167_v19 = vld [vmem:[#allocation5 + $0x20] sm:$0xff] }
  0x3b   :  { %528 = vmatprep.subr.bf16.mxu0 %v705_v0  ;;  %v168_v20 = vld [vmem:[#allocation5 + $0x28] sm:$0xff]  ;;  %v535_v21 = vpack.c.bf16 %v76_v17, %v75_v16  ;;  %v77_v22 = vld [vmem:[#allocation2 + $0x40] sm:$0xff]  ;;  %v169_v25 = vld [vmem:[#allocation5 + $0x30] sm:$0xff] }
  0x3c   :  { %551 = vmatpush3.bf16.msra.mxu1 %v550_v15  ;;  %v78_v23 = vld [vmem:[#allocation2 + $0x48] sm:$0xff]  ;;  %v556_v24 = vpack.c.bf16 %v168_v20, %v167_v19  ;;  %v170_v26 = vld [vmem:[#allocation5 + $0x38] sm:$0xff]  ;;  %v79_v28 = vld [vmem:[#allocation2 + $0x50] sm:$0xff] }
  0x3d   :  { %552 = vmatprep.subr.bf16.mxu1 %v705_v0  ;;  %v538_v27 = vpack.c.bf16 %v78_v23, %v77_v22  ;;  %v80_v29 = vld [vmem:[#allocation2 + $0x58] sm:$0xff]  ;;  %v559_v30 = vpack.c.bf16 %v170_v26, %v169_v25  ;;  %v171_v31 = vld [vmem:[#allocation5 + $0x40] sm:$0xff]  ;;  %v172_v32 = vld [vmem:[#allocation5 + $0x48] sm:$0xff] }
  0x3e   :  { %530 = vmatpush3.bf16.msra.mxu0 %v529_v7  ;;  %v541_v33 = vpack.c.bf16 %v80_v29, %v79_v28  ;;  %v81_v34 = vld [vmem:[#allocation2 + $0x60] sm:$0xff]  ;;  %v82_v35 = vld [vmem:[#allocation2 + $0x68] sm:$0xff]  ;;  %v562_v36 = vpack.c.bf16 %v172_v32, %v171_v31  ;;  %v173_v37 = vld [vmem:[#allocation5 + $0x50] sm:$0xff] }
  0x3f   :  { %531 = vmatprep.subr.bf16.mxu0 %v705_v0  ;;  %v174_v38 = vld [vmem:[#allocation5 + $0x58] sm:$0xff]  ;;  %v544_v39 = vpack.c.bf16 %v82_v35, %v81_v34  ;;  %v83_v40 = vld [vmem:[#allocation2 + $0x70] sm:$0xff]  ;;  %v175_v43 = vld [vmem:[#allocation5 + $0x60] sm:$0xff] }
  0x40   :  { %554 = vmatpush3.bf16.msra.mxu1 %v553_v18  ;;  %v84_v41 = vld [vmem:[#allocation2 + $0x78] sm:$0xff]  ;;  %v565_v42 = vpack.c.bf16 %v174_v38, %v173_v37  ;;  %v176_v44 = vld [vmem:[#allocation5 + $0x68] sm:$0xff]  ;;  %v68_v47 = vld [vmem:[%s855_s0] sm:$0xff] }
  0x41   :  { %555 = vmatprep.subr.bf16.mxu1 %v705_v0  ;;  %v547_v45 = vpack.c.bf16 %v84_v41, %v83_v40  ;;  %v568_v46 = vpack.c.bf16 %v176_v44, %v175_v43  ;;  %v177_v48 = vld [vmem:[#allocation5 + $0x70] sm:$0xff]  ;;  %v178_v49 = vld [vmem:[#allocation5 + $0x78] sm:$0xff]  ;;  %v256_v51 = vld [vmem:[#allocation7] sm:$0xff] }
  0x42   :  { %533 = vmatpush3.bf16.msra.mxu0 %v532_v14  ;;  %v571_v50 = vpack.c.bf16 %v178_v49, %v177_v48  ;;  %v257_v52 = vld [vmem:[#allocation7 + $0x8] sm:$0xff]  ;;  %v258_v53 = vld [vmem:[#allocation7 + $0x10] sm:$0xff]  ;;  %v259_v55 = vld [vmem:[#allocation7 + $0x18] sm:$0xff] }
  0x43   :  { %534 = vmatprep.subr.bf16.mxu0 %v705_v0  ;;  %v574_v54 = vpack.c.bf16 %v257_v52, %v256_v51  ;;  %v577_v56 = vpack.c.bf16 %v259_v55, %v258_v53  ;;  %v260_v57 = vld [vmem:[#allocation7 + $0x20] sm:$0xff]  ;;  %v261_v58 = vld [vmem:[#allocation7 + $0x28] sm:$0xff]  ;;  %v262_v60 = vld [vmem:[#allocation7 + $0x30] sm:$0xff] }
  0x44   :  { %557 = vmatpush3.bf16.msra.mxu1 %v556_v24  ;;  %v580_v59 = vpack.c.bf16 %v261_v58, %v260_v57  ;;  %v263_v61 = vld [vmem:[#allocation7 + $0x38] sm:$0xff]  ;;  %v264_v63 = vld [vmem:[#allocation7 + $0x40] sm:$0xff]  ;;  %v266_v3 = vld [vmem:[#allocation7 + $0x50] sm:$0xff] }
  0x45   :  { %558 = vmatprep.subr.bf16.mxu1 %v705_v0  ;;  %v583_v62 = vpack.c.bf16 %v263_v61, %v262_v60  ;;  %v267_v4 = vld [vmem:[#allocation7 + $0x58] sm:$0xff]  ;;  %v268_v6 = vld [vmem:[#allocation7 + $0x60] sm:$0xff]  ;;  %v269_v7 = vld [vmem:[#allocation7 + $0x68] sm:$0xff] }
  0x46   :  { %536 = vmatpush3.bf16.msra.mxu0 %v535_v21  ;;  %v589_v5 = vpack.c.bf16 %v267_v4, %v266_v3  ;;  %v592_v8 = vpack.c.bf16 %v269_v7, %v268_v6  ;;  %v366_v9 = vld [vmem:[%s857_s2] ss:$0 sm:$0xff]  ;;  %v270_v14 = vld [vmem:[#allocation7 + $0x70] sm:$0xff]  ;;  %v271_v15 = vld [vmem:[#allocation7 + $0x78] sm:$0xff]  ;;  %s708_s2 = smov [#allocation8]  }
  0x47   :  { %537 = vmatprep.subr.bf16.mxu0 %v705_v0  ;;  %v595_v16 = vpack.c.bf16 %v271_v15, %v270_v14  ;;  %v367_v17 = vld [vmem:[%s859_s4] ss:$0 sm:$0xff]  ;;  %s356_s20 = sshll.u32 %s708_s2, 4  ;;  %s357_s20 = int_to_ptr.vmem [resolvable:$true] %s356_s20 }
  0x48   :  { %560 = vmatpush3.bf16.msra.mxu1 %v559_v30  ;;  %v368_v20 = vld [vmem:[%s861_s6] ss:$0 sm:$0xff]  ;;  %s672_s21 = scalar_lea.vmem %s357_s20, 128  ;;  %p677_p11 = scmp.lt.s32.totalorder %s357_s20, %s357_s20 }
  0x49   :  { %561 = vmatprep.subr.bf16.mxu1 %v705_v0  ;;  %p673_p10 = scmp.ne.s32.totalorder %s357_s20, %s672_s21  ;;  %p678_p12 = scmp.lt.s32.totalorder %s672_s21, %s672_s21 }
  0x4a   :  { %539 = vmatpush3.bf16.msra.mxu0 %v538_v27 }
  0x4b   :  { %540 = vmatprep.subr.bf16.mxu0 %v705_v0  ;;  %p679_p13 = por %p678_p12, %p677_p11 }
  0x4c   :  { %563 = vmatpush3.bf16.msra.mxu1 %v562_v36 }
  0x4d   :  { %564 = vmatprep.subr.bf16.mxu1 %v705_v0  ;;  %p680_p0 = pnand %p679_p13, %p673_p10 }
  0x4e   :  { %542 = vmatpush3.bf16.msra.mxu0 %v541_v33 }
  0x4f   :  { %543 = vmatprep.subr.bf16.mxu0 %v705_v0 }
  0x50   :  { %566 = vmatpush3.bf16.msra.mxu1 %v565_v42 }
  0x51   :  { %567 = vmatprep.subr.bf16.mxu1 %v705_v0 }
  0x52   :  { %545 = vmatpush3.bf16.msra.mxu0 %v544_v39 }
  0x53   :  { %546 = vmatprep.subr.bf16.mxu0 %v705_v0 }
  0x54   :  { %569 = vmatpush3.bf16.msra.mxu1 %v568_v46 }
  0x55   :  { %570 = vmatprep.subr.bf16.mxu1 %v705_v0 }
  0x56   :  { %548 = vmatpush3.bf16.msra.mxu0 %v547_v45 }
  0x57   :  { %573 = vmatprep.subr.bf16.mxu0 %v705_v0 }
  0x58   :  { %572 = vmatpush3.bf16.msra.mxu1 %v571_v50 }
  0x59   :  { %453 = vmatmul.mubr.f32.vlgmr.msra.gmra.mrb[0].mxu0 %v68_v47 }
  0x5a   :  { %522 = vmatprep.mubr.msk.f32.mxu0 %vm706_vm0, %v707_v1  ;;  %575 = vmatpush3.bf16.msra.mxu0 %v574_v54  ;;  %v265_v1 = vld [vmem:[#allocation7 + $0x48] sm:$0xff] }
  0x5b   :  { %576 = vmatprep.subr.bf16.mxu0 %v705_v0  ;;  %v586_v2 = vpack.c.bf16 %v265_v1, %v264_v63 }
  0x5e   :  { %578 = vmatpush3.bf16.msra.mxu0 %v577_v56 }
  0x5f   :  { %579 = vmatprep.subr.bf16.mxu0 %v705_v0 }
  0x62   :  { %581 = vmatpush3.bf16.msra.mxu0 %v580_v59 }
  0x63   :  { %582 = vmatprep.subr.bf16.mxu0 %v705_v0 }
  0x66   :  { %584 = vmatpush3.bf16.msra.mxu0 %v583_v62 }
  0x67   :  { %585 = vmatprep.subr.bf16.mxu0 %v705_v0 }
  0x6a   :  { %587 = vmatpush3.bf16.msra.mxu0 %v586_v2 }
  0x6b   :  { %588 = vmatprep.subr.bf16.mxu0 %v705_v0 }
  0x6e   :  { %590 = vmatpush3.bf16.msra.mxu0 %v589_v5 }
  0x6f   :  { %591 = vmatprep.subr.bf16.mxu0 %v705_v0 }
  0x72   :  { %593 = vmatpush3.bf16.msra.mxu0 %v592_v8 }
  0x73   :  { %594 = vmatprep.subr.bf16.mxu0 %v705_v0 }
  0x76   :  { %596 = vmatpush3.bf16.msra.mxu0 %v595_v16 }
 0x12c   :  { %v158_v10 = vpop.f32.mrb[0].mxu0 }
 0x12d   :  { %v159_v11 = vadd.f32 %v366_v9, %v158_v10  ;;  %v454_v12 = vpop.f32.mrb[1].mxu0 }
 0x12f   :  { %v162_v13 = vmax.f32 %v159_v11, 0.0 }
 0x131   :  { %488 = vmatmul.mubr.f32.vlgmr.msra.gmra.mrb[0].mxu1 %v162_v13 }
 0x204   :  { %v252_v18 = vpop.f32.mrb[0].mxu1 }
 0x205   :  { %v253_v19 = vadd.f32 %v367_v17, %v252_v18  ;;  %v489_v0 = vpop.f32.mrb[1].mxu1 }
 0x207   :  { %523 = vmatmul.mubr.f32.vlgmr.msra.gmra.mrb[2].mxu0 %v253_v19 }
 0x2da   :  { %v345_v21 = vpop.f32.mrb[2].mxu0 }
 0x2db   :  { %v346_v22 = vadd.f32 %v368_v20, %v345_v21  ;;  %v524_v23 = vpop.f32.mrb[3].mxu0 }
 0x2dd   :  { %349 = vst [vmem:[#allocation8] sm:$0xff] %v346_v22 }
 0x2de   :  { %683 = shalt.err (!%p680_p0)
}
 0x2df   :  { %s684_s23 = scalar_lea.hbm %s862_s7, 128 }
 0x2e0   :  { %p685_p1 = scmp.ne.s32.totalorder %s862_s7, %s684_s23  ;;  %p688_p2 = scmp.lt.u32.totalorder %s684_s23, %s862_s7 }
 0x2e2   :  { %p690_p3 = pnand %p688_p2, %p685_p1 }
 0x2e4   :  { %693 = shalt.err (!%p690_p3)
}
 0x2e5   :  { %359 = dma.vmem_to_hbm [thread:$0]  %s357_s20, 128, %s862_s7, [#allocation4]  }
 0x2e6   :  { %698 = dma.done.wait [#allocation4], 128  }
 0x2e7   :  { %699 = vsyncadd [#allocation4], 4294967168 }
 0x2e8   :  { %363 = vsyncpa [#allocation3], 1 }
 0x2e9   :  { %364 = vsyncpa [#allocation6], 1 }
 0x2ea   :  { %365 = vsyncpa [#allocation4], 1 }

</bundles_post_ra>
